<compile_context>
chip_gen: v7x
topology: tpu7x:2x2x1
jax: 0.10.0
libtpu: 0.0.40
codegen_flags: <defaults>
</compile_context>

<pallas_src>
import functools
import math

import jax
import jax.numpy as jnp
import numpy as np
from jax.experimental import pallas as pl
from jax.experimental.pallas import tpu as pltpu


# ----------------------------- glue (plain JAX) ------------------------------

def ranged_binom(n):
    # Mirrors the torch helper: binomial coefficients C(n, 0..n), float32.
    seq = jnp.arange(1, n + 1, dtype=jnp.float32)
    seq_pos = jnp.concatenate(
        [jnp.array([1.0], jnp.float32), jnp.arange(1, n + 1, dtype=jnp.float32)]
    )
    cp = jnp.cumprod(seq_pos)
    return jnp.prod(seq) / (cp * jnp.flip(cp))


def control_points(n_cp, mu_x, mu_y, mu_z):
    nx, ny, nz = n_cp
    x = jnp.linspace(0.0, 1.0, nx)
    y = jnp.linspace(0.0, 1.0, ny)
    z = jnp.linspace(0.0, 1.0, nz)
    xc, yc, zc = jnp.meshgrid(x, y, z, indexing="ij")
    return jnp.stack([xc + mu_x, yc + mu_y, zc + mu_z], axis=0)  # (3, nx, ny, nz)


# ------------------------------- Pallas kernel -------------------------------

def _basis_rows(p, n_ctrl, binom):
    """1-D Bernstein rows B_i(p), each a (1, TN) value (used for the y axis)."""
    d = n_ctrl - 1
    q = 1.0 - p
    p_pows = [jnp.ones_like(p)]
    q_pows = [jnp.ones_like(p)]
    for _ in range(d):
        p_pows.append(p_pows[-1] * p)
        q_pows.append(q_pows[-1] * q)
    return [float(binom[i]) * p_pows[i] * q_pows[d - i] for i in range(n_ctrl)]


def _dense_basis(p, n_ctrl, n_rows, binom):
    """Dense (n_rows, TN) Bernstein matrix.

    Row i = C(d, i) * p^i * (1-p)^(d-i) for i < n_ctrl, 0 for padded rows.
    Built with a broadcasted-iota select/power ladder so all math runs at full
    (8, 128) vreg density and no sublane concatenates are needed.
    """
    d = n_ctrl - 1
    shape = (n_rows, p.shape[-1])
    row = jax.lax.broadcasted_iota(jnp.int32, shape, 0)
    p_b = jnp.broadcast_to(p, shape)
    q_b = 1.0 - p_b
    pp = jnp.ones(shape, jnp.float32)
    qq = jnp.ones(shape, jnp.float32)
    for s in range(1, d + 1):
        pp = jnp.where(row >= s, pp * p_b, pp)        # row i -> p^i
        qq = jnp.where(row <= d - s, qq * q_b, qq)    # row i -> (1-p)^(d-i)
    coef = jnp.zeros(shape, jnp.float32)              # padded rows stay zero
    for i in range(n_ctrl):
        coef = jnp.where(row == i, float(binom[i]), coef)
    return coef * pp * qq


def _ffd_kernel(points_ref, cpw_ref, out_ref, *,
                nx, ny, nz, nx_pad, nz_pad, bx, by, bz):
    # points_ref : (3, TN)                 point coordinates, N on lanes
    # cpw_ref    : (ny*3*nx_pad, nz_pad)   control points, rows ordered (j, c, i)
    # out_ref    : (3, TN)                 deformed coordinates, N on lanes
    px = points_ref[0:1, :]
    py = points_ref[1:2, :]
    pz = points_ref[2:3, :]

    bz_mat = _dense_basis(pz, nz, nz_pad, bz)     # (nz_pad, TN)
    bx_mat = _dense_basis(px, nx, nx_pad, bx)     # (nx_pad, TN)
    by_rows = _basis_rows(py, ny, by)             # ny rows of (1, TN)

    # Stage 1 (MXU): contract the z axis of the control grid.
    #   A[(j*3 + c)*nx_pad + i, n] = sum_k cp[c, i, j, k] * Bz_k(pz[n])
    a = jnp.dot(cpw_ref[...], bz_mat, preferred_element_type=jnp.float32)

    # Stage 2 (VPU): contract the y axis.  Each j-block (3*nx_pad rows) starts
    # on an 8-sublane boundary -> pure mul/add, no relayouts.
    rci = 3 * nx_pad
    c_acc = a[0:rci, :] * by_rows[0]
    for j in range(1, ny):
        c_acc = c_acc + a[j * rci:(j + 1) * rci, :] * by_rows[j]

    # Stage 3 (VPU mul + XLU sublane reduce): contract the x axis per coord.
    # Each c-block is nx_pad (multiple of 8) rows, so the slice is aligned and
    # the reduction is a cheap 8-way sublane sum.
    outs = []
    for c in range(3):
        blk = c_acc[c * nx_pad:(c + 1) * nx_pad, :] * bx_mat
        outs.append(jnp.sum(blk, axis=0, keepdims=True))
    out_ref[...] = jnp.concatenate(outs, axis=0)


@functools.partial(jax.jit, static_argnames=("n_cp", "tile_n"))
def ffd3d_forward(points, n_cp, mu_x, mu_y, mu_z, *, tile_n=8192):
    nx, ny, nz = n_cp
    n = points.shape[0]
    nx_pad = max(8, pl.cdiv(nx, 8) * 8)
    nz_pad = max(8, pl.cdiv(nz, 8) * 8)
    rows_a = ny * 3 * nx_pad

    # Exact compile-time binomial coefficients (static control-grid config).
    bx = tuple(float(math.comb(nx - 1, i)) for i in range(nx))
    by = tuple(float(math.comb(ny - 1, j)) for j in range(ny))
    bz = tuple(float(math.comb(nz - 1, k)) for k in range(nz))

    # Control points with rows ordered (j, c, i); i zero-padded to nx_pad and
    # the z axis zero-padded to nz_pad: shape (ny*3*nx_pad, nz_pad).
    cp = control_points(n_cp, mu_x, mu_y, mu_z).astype(jnp.float32)   # (3,nx,ny,nz)
    cp_r = jnp.transpose(cp, (2, 0, 1, 3))                            # (ny,3,nx,nz)
    cp_w = jnp.zeros((ny, 3, nx_pad, nz_pad), jnp.float32)
    cp_w = cp_w.at[:, :, :nx, :nz].set(cp_r).reshape(rows_a, nz_pad)

    # --------------------------- tile selection ----------------------------
    tile_req = max(128, (int(tile_n) // 128) * 128)
    # Keep per-step VMEM (stage-1 intermediate + basis matrices + temporaries
    # + double-buffered I/O) within ~24 MiB: safe on every generation,
    # including v7x's 64 MiB physical VMEM / 32 MiB scoped default.
    rows_per_lane = rows_a + 4 * nx_pad + 2 * nz_pad + ny + 12 + 40
    vmem_cap = max(128, (24 * 1024 * 1024 // (4 * rows_per_lane)) // 128 * 128)
    tile_req = min(tile_req, vmem_cap)

    n_round = pl.cdiv(n, 128) * 128
    tile = min(tile_req, n_round)
    if n_round > 128:
        # Keep >= 2 grid steps when N allows, so v7x's two TensorCores both
        # get work through the "parallel" grid axis (no-op for large N).
        tile = min(tile, pl.cdiv(n_round, 2 * 128) * 128)
    n_pad = pl.cdiv(n, tile) * tile
    grid = (n_pad // tile,)

    # Lane-dense layout: a single transpose, pad only when needed.
    pts_t = points.astype(jnp.float32).T                              # (3, N)
    if n_pad != n:
        pts_t = jax.lax.pad(pts_t, jnp.float32(0.0),
                            ((0, 0, 0), (0, n_pad - n, 0)))

    kernel = functools.partial(
        _ffd_kernel, nx=nx, ny=ny, nz=nz, nx_pad=nx_pad, nz_pad=nz_pad,
        bx=bx, by=by, bz=bz)

    out_t = pl.pallas_call(
        kernel,
        out_shape=jax.ShapeDtypeStruct((3, n_pad), jnp.float32),
        grid=grid,
        in_specs=[
            pl.BlockSpec((3, tile), lambda i: (0, i)),           # points (lane-tiled)
            pl.BlockSpec((rows_a, nz_pad), lambda i: (0, 0)),    # control points
        ],
        out_specs=pl.BlockSpec((3, tile), lambda i: (0, i)),
        compiler_params=pltpu.CompilerParams(
            dimension_semantics=("parallel",),
            vmem_limit_bytes=32 * 1024 * 1024),
    )(pts_t, cp_w)

    return out_t[:, :n].T


# --------------------------- pure-JAX reference ------------------------------

def bernstein_mesh_ref(points, n_cp):
    nx, ny, nz = n_cp
    px = points[:, 0].reshape(-1, 1, 1, 1)
    py = points[:, 1].reshape(-1, 1, 1, 1)
    pz = points[:, 2].reshape(-1, 1, 1, 1)
    sx = jnp.arange(nx).reshape(1, -1, 1, 1)
    sy = jnp.arange(ny).reshape(1, 1, -1, 1)
    sz = jnp.arange(nz).reshape(1, 1, 1, -1)
    rx = ranged_binom(nx - 1).reshape(1, -1, 1, 1)
    ry = ranged_binom(ny - 1).reshape(1, 1, -1, 1)
    rz = ranged_binom(nz - 1).reshape(1, 1, 1, -1)
    return (rx * ry * rz
            * px ** sx * (1 - px) ** (nx - 1 - sx)
            * py ** sy * (1 - py) ** (ny - 1 - sy)
            * pz ** sz * (1 - pz) ** (nz - 1 - sz))


def ffd3d_forward_ref(points, n_cp, mu_x, mu_y, mu_z):
    cp = control_points(n_cp, mu_x, mu_y, mu_z)[None]          # (1, 3, nx, ny, nz)
    bm = bernstein_mesh_ref(points, n_cp)[:, None]             # (N, 1, nx, ny, nz)
    return jnp.sum(bm * cp, axis=(2, 3, 4))                    # (N, 3)


# ----------------------------------- main ------------------------------------

if __name__ == "__main__":
    n_cp = (3, 4, 5)          # n_control_points (x, y, z)

    key = jax.random.PRNGKey(0)
    k1, k2, k_mx, k_my, k_mz = jax.random.split(key, 5)

    # Module parameters (array_mu_*): zeros in __init__; use small deterministic
    # perturbations so the deformation is non-trivial.
    mu_x = 0.05 * jax.random.normal(k_mx, n_cp, jnp.float32)
    mu_y = 0.05 * jax.random.normal(k_my, n_cp, jnp.float32)
    mu_z = 0.05 * jax.random.normal(k_mz, n_cp, jnp.float32)

    # Case 1: small N (single tile, mostly padded lanes).
    x_small = jax.random.uniform(k1, (16, 3), jnp.float32)
    out_small = jax.block_until_ready(
        ffd3d_forward(x_small, n_cp, mu_x, mu_y, mu_z))
    ref_small = ffd3d_forward_ref(x_small, n_cp, mu_x, mu_y, mu_z)
    np.testing.assert_allclose(np.asarray(out_small), np.asarray(ref_small),
                               rtol=1e-5, atol=1e-5)
    assert out_small.shape == (16, 3) and out_small.dtype == jnp.float32

    # Case 2: multi-tile, N not a multiple of the tile (exercises the padding
    # logic and the >= 2 grid-step path).
    x_big = jax.random.uniform(k2, (700, 3), jnp.float32)
    out_big = jax.block_until_ready(
        ffd3d_forward(x_big, n_cp, mu_x, mu_y, mu_z, tile_n=256))
    ref_big = ffd3d_forward_ref(x_big, n_cp, mu_x, mu_y, mu_z)
    np.testing.assert_allclose(np.asarray(out_big), np.asarray(ref_big),
                               rtol=1e-5, atol=1e-5)
    assert out_big.shape == (700, 3) and out_big.dtype == jnp.float32

    print("KERNEL_OK")
</pallas_src>

<mosaic_0001>
module attributes {stable_mosaic.version = 11 : i64} {
  func.func @_ffd_kernel(%arg0: i32, %arg1: memref<3x128xf32, #tpu.memory_space<vmem>>, %arg2: memref<96x8xf32, #tpu.memory_space<vmem>>, %arg3: memref<3x128xf32, #tpu.memory_space<vmem>>) attributes {dimension_semantics = [#tpu.dimension_semantics<parallel>], iteration_bounds = array<i64: 1>, scalar_prefetch = 0 : i64, scratch_operands = 0 : i64, tpu.core_type = #tpu.core_type<tc>, window_params = [{transform_indices = @transform_0, window_bounds = array<i64: 3, 128>}, {pipeline_mode = #tpu.pipeline_mode<synchronous>, transform_indices = @transform_1, window_bounds = array<i64: 96, 8>}, {transform_indices = @transform_2, window_bounds = array<i64: 3, 128>}]} {
    %c0 = arith.constant 0 : index
    %c0_0 = arith.constant 0 : index
    %0 = vector.load %arg1[%c0, %c0_0] : memref<3x128xf32, #tpu.memory_space<vmem>>, vector<1x128xf32>
    %c1 = arith.constant 1 : index
    %c0_1 = arith.constant 0 : index
    %1 = vector.load %arg1[%c1, %c0_1] : memref<3x128xf32, #tpu.memory_space<vmem>>, vector<1x128xf32>
    %c2 = arith.constant 2 : index
    %c0_2 = arith.constant 0 : index
    %2 = vector.load %arg1[%c2, %c0_2] : memref<3x128xf32, #tpu.memory_space<vmem>>, vector<1x128xf32>
    %3 = tpu.iota {dimensions = array<i32: 0>} : vector<8x128xi32>
    %4 = vector.shape_cast %2 : vector<1x128xf32> to vector<1x128xf32>
    %5 = vector.broadcast %4 : vector<1x128xf32> to vector<8x128xf32>
    %cst = arith.constant 1.000000e+00 : f32
    %6 = vector.broadcast %cst : f32 to vector<8x128xf32>
    %7 = arith.subf %6, %5 : vector<8x128xf32>
    %cst_3 = arith.constant 1.000000e+00 : f32
    %8 = vector.broadcast %cst_3 : f32 to vector<8x128xf32>
    %cst_4 = arith.constant 1.000000e+00 : f32
    %9 = vector.broadcast %cst_4 : f32 to vector<8x128xf32>
    %c1_i32 = arith.constant 1 : i32
    %10 = vector.broadcast %c1_i32 : i32 to vector<8x128xi32>
    %11 = arith.cmpi sge, %3, %10 : vector<8x128xi32>
    %12 = arith.mulf %8, %5 : vector<8x128xf32>
    %13 = arith.select %11, %12, %8 : vector<8x128xi1>, vector<8x128xf32>
    %c3_i32 = arith.constant 3 : i32
    %14 = vector.broadcast %c3_i32 : i32 to vector<8x128xi32>
    %15 = arith.cmpi sle, %3, %14 : vector<8x128xi32>
    %16 = arith.mulf %9, %7 : vector<8x128xf32>
    %17 = arith.select %15, %16, %9 : vector<8x128xi1>, vector<8x128xf32>
    %c2_i32 = arith.constant 2 : i32
    %18 = vector.broadcast %c2_i32 : i32 to vector<8x128xi32>
    %19 = arith.cmpi sge, %3, %18 : vector<8x128xi32>
    %20 = arith.mulf %13, %5 : vector<8x128xf32>
    %21 = arith.select %19, %20, %13 : vector<8x128xi1>, vector<8x128xf32>
    %c2_i32_5 = arith.constant 2 : i32
    %22 = vector.broadcast %c2_i32_5 : i32 to vector<8x128xi32>
    %23 = arith.cmpi sle, %3, %22 : vector<8x128xi32>
    %24 = arith.mulf %17, %7 : vector<8x128xf32>
    %25 = arith.select %23, %24, %17 : vector<8x128xi1>, vector<8x128xf32>
    %c3_i32_6 = arith.constant 3 : i32
    %26 = vector.broadcast %c3_i32_6 : i32 to vector<8x128xi32>
    %27 = arith.cmpi sge, %3, %26 : vector<8x128xi32>
    %28 = arith.mulf %21, %5 : vector<8x128xf32>
    %29 = arith.select %27, %28, %21 : vector<8x128xi1>, vector<8x128xf32>
    %c1_i32_7 = arith.constant 1 : i32
    %30 = vector.broadcast %c1_i32_7 : i32 to vector<8x128xi32>
    %31 = arith.cmpi sle, %3, %30 : vector<8x128xi32>
    %32 = arith.mulf %25, %7 : vector<8x128xf32>
    %33 = arith.select %31, %32, %25 : vector<8x128xi1>, vector<8x128xf32>
    %c4_i32 = arith.constant 4 : i32
    %34 = vector.broadcast %c4_i32 : i32 to vector<8x128xi32>
    %35 = arith.cmpi sge, %3, %34 : vector<8x128xi32>
    %36 = arith.mulf %29, %5 : vector<8x128xf32>
    %37 = arith.select %35, %36, %29 : vector<8x128xi1>, vector<8x128xf32>
    %c0_i32 = arith.constant 0 : i32
    %38 = vector.broadcast %c0_i32 : i32 to vector<8x128xi32>
    %39 = arith.cmpi sle, %3, %38 : vector<8x128xi32>
    %40 = arith.mulf %33, %7 : vector<8x128xf32>
    %41 = arith.select %39, %40, %33 : vector<8x128xi1>, vector<8x128xf32>
    %cst_8 = arith.constant 0.000000e+00 : f32
    %42 = vector.broadcast %cst_8 : f32 to vector<8x128xf32>
    %c0_i32_9 = arith.constant 0 : i32
    %43 = vector.broadcast %c0_i32_9 : i32 to vector<8x128xi32>
    %44 = arith.cmpi eq, %3, %43 : vector<8x128xi32>
    %cst_10 = arith.constant 1.000000e+00 : f32
    %45 = vector.broadcast %cst_10 : f32 to vector<8x128xf32>
    %46 = arith.select %44, %45, %42 : vector<8x128xi1>, vector<8x128xf32>
    %c1_i32_11 = arith.constant 1 : i32
    %47 = vector.broadcast %c1_i32_11 : i32 to vector<8x128xi32>
    %48 = arith.cmpi eq, %3, %47 : vector<8x128xi32>
    %cst_12 = arith.constant 4.000000e+00 : f32
    %49 = vector.broadcast %cst_12 : f32 to vector<8x128xf32>
    %50 = arith.select %48, %49, %46 : vector<8x128xi1>, vector<8x128xf32>
    %c2_i32_13 = arith.constant 2 : i32
    %51 = vector.broadcast %c2_i32_13 : i32 to vector<8x128xi32>
    %52 = arith.cmpi eq, %3, %51 : vector<8x128xi32>
    %cst_14 = arith.constant 6.000000e+00 : f32
    %53 = vector.broadcast %cst_14 : f32 to vector<8x128xf32>
    %54 = arith.select %52, %53, %50 : vector<8x128xi1>, vector<8x128xf32>
    %c3_i32_15 = arith.constant 3 : i32
    %55 = vector.broadcast %c3_i32_15 : i32 to vector<8x128xi32>
    %56 = arith.cmpi eq, %3, %55 : vector<8x128xi32>
    %cst_16 = arith.constant 4.000000e+00 : f32
    %57 = vector.broadcast %cst_16 : f32 to vector<8x128xf32>
    %58 = arith.select %56, %57, %54 : vector<8x128xi1>, vector<8x128xf32>
    %c4_i32_17 = arith.constant 4 : i32
    %59 = vector.broadcast %c4_i32_17 : i32 to vector<8x128xi32>
    %60 = arith.cmpi eq, %3, %59 : vector<8x128xi32>
    %cst_18 = arith.constant 1.000000e+00 : f32
    %61 = vector.broadcast %cst_18 : f32 to vector<8x128xf32>
    %62 = arith.select %60, %61, %58 : vector<8x128xi1>, vector<8x128xf32>
    %63 = arith.mulf %62, %37 : vector<8x128xf32>
    %64 = arith.mulf %63, %41 : vector<8x128xf32>
    %65 = tpu.iota {dimensions = array<i32: 0>} : vector<8x128xi32>
    %66 = vector.shape_cast %0 : vector<1x128xf32> to vector<1x128xf32>
    %67 = vector.broadcast %66 : vector<1x128xf32> to vector<8x128xf32>
    %cst_19 = arith.constant 1.000000e+00 : f32
    %68 = vector.broadcast %cst_19 : f32 to vector<8x128xf32>
    %69 = arith.subf %68, %67 : vector<8x128xf32>
    %cst_20 = arith.constant 1.000000e+00 : f32
    %70 = vector.broadcast %cst_20 : f32 to vector<8x128xf32>
    %cst_21 = arith.constant 1.000000e+00 : f32
    %71 = vector.broadcast %cst_21 : f32 to vector<8x128xf32>
    %c1_i32_22 = arith.constant 1 : i32
    %72 = vector.broadcast %c1_i32_22 : i32 to vector<8x128xi32>
    %73 = arith.cmpi sge, %65, %72 : vector<8x128xi32>
    %74 = arith.mulf %70, %67 : vector<8x128xf32>
    %75 = arith.select %73, %74, %70 : vector<8x128xi1>, vector<8x128xf32>
    %c1_i32_23 = arith.constant 1 : i32
    %76 = vector.broadcast %c1_i32_23 : i32 to vector<8x128xi32>
    %77 = arith.cmpi sle, %65, %76 : vector<8x128xi32>
    %78 = arith.mulf %71, %69 : vector<8x128xf32>
    %79 = arith.select %77, %78, %71 : vector<8x128xi1>, vector<8x128xf32>
    %c2_i32_24 = arith.constant 2 : i32
    %80 = vector.broadcast %c2_i32_24 : i32 to vector<8x128xi32>
    %81 = arith.cmpi sge, %65, %80 : vector<8x128xi32>
    %82 = arith.mulf %75, %67 : vector<8x128xf32>
    %83 = arith.select %81, %82, %75 : vector<8x128xi1>, vector<8x128xf32>
    %c0_i32_25 = arith.constant 0 : i32
    %84 = vector.broadcast %c0_i32_25 : i32 to vector<8x128xi32>
    %85 = arith.cmpi sle, %65, %84 : vector<8x128xi32>
    %86 = arith.mulf %79, %69 : vector<8x128xf32>
    %87 = arith.select %85, %86, %79 : vector<8x128xi1>, vector<8x128xf32>
    %cst_26 = arith.constant 0.000000e+00 : f32
    %88 = vector.broadcast %cst_26 : f32 to vector<8x128xf32>
    %c0_i32_27 = arith.constant 0 : i32
    %89 = vector.broadcast %c0_i32_27 : i32 to vector<8x128xi32>
    %90 = arith.cmpi eq, %65, %89 : vector<8x128xi32>
    %cst_28 = arith.constant 1.000000e+00 : f32
    %91 = vector.broadcast %cst_28 : f32 to vector<8x128xf32>
    %92 = arith.select %90, %91, %88 : vector<8x128xi1>, vector<8x128xf32>
    %c1_i32_29 = arith.constant 1 : i32
    %93 = vector.broadcast %c1_i32_29 : i32 to vector<8x128xi32>
    %94 = arith.cmpi eq, %65, %93 : vector<8x128xi32>
    %cst_30 = arith.constant 2.000000e+00 : f32
    %95 = vector.broadcast %cst_30 : f32 to vector<8x128xf32>
    %96 = arith.select %94, %95, %92 : vector<8x128xi1>, vector<8x128xf32>
    %c2_i32_31 = arith.constant 2 : i32
    %97 = vector.broadcast %c2_i32_31 : i32 to vector<8x128xi32>
    %98 = arith.cmpi eq, %65, %97 : vector<8x128xi32>
    %cst_32 = arith.constant 1.000000e+00 : f32
    %99 = vector.broadcast %cst_32 : f32 to vector<8x128xf32>
    %100 = arith.select %98, %99, %96 : vector<8x128xi1>, vector<8x128xf32>
    %101 = arith.mulf %100, %83 : vector<8x128xf32>
    %102 = arith.mulf %101, %87 : vector<8x128xf32>
    %cst_33 = arith.constant 1.000000e+00 : f32
    %103 = vector.broadcast %cst_33 : f32 to vector<1x128xf32>
    %104 = arith.subf %103, %1 : vector<1x128xf32>
    %cst_34 = arith.constant 1.000000e+00 : f32
    %105 = vector.broadcast %cst_34 : f32 to vector<1x128xf32>
    %cst_35 = arith.constant 1.000000e+00 : f32
    %106 = vector.broadcast %cst_35 : f32 to vector<1x128xf32>
    %107 = arith.mulf %105, %1 : vector<1x128xf32>
    %108 = arith.mulf %106, %104 : vector<1x128xf32>
    %109 = arith.mulf %107, %1 : vector<1x128xf32>
    %110 = arith.mulf %108, %104 : vector<1x128xf32>
    %111 = arith.mulf %109, %1 : vector<1x128xf32>
    %112 = arith.mulf %110, %104 : vector<1x128xf32>
    %cst_36 = arith.constant 1.000000e+00 : f32
    %113 = vector.broadcast %cst_36 : f32 to vector<1x128xf32>
    %114 = arith.mulf %113, %105 : vector<1x128xf32>
    %115 = arith.mulf %114, %112 : vector<1x128xf32>
    %cst_37 = arith.constant 3.000000e+00 : f32
    %116 = vector.broadcast %cst_37 : f32 to vector<1x128xf32>
    %117 = arith.mulf %116, %107 : vector<1x128xf32>
    %118 = arith.mulf %117, %110 : vector<1x128xf32>
    %cst_38 = arith.constant 3.000000e+00 : f32
    %119 = vector.broadcast %cst_38 : f32 to vector<1x128xf32>
    %120 = arith.mulf %119, %109 : vector<1x128xf32>
    %121 = arith.mulf %120, %108 : vector<1x128xf32>
    %cst_39 = arith.constant 1.000000e+00 : f32
    %122 = vector.broadcast %cst_39 : f32 to vector<1x128xf32>
    %123 = arith.mulf %122, %111 : vector<1x128xf32>
    %124 = arith.mulf %123, %106 : vector<1x128xf32>
    %c0_40 = arith.constant 0 : index
    %c0_41 = arith.constant 0 : index
    %125 = vector.load %arg2[%c0_40, %c0_41] : memref<96x8xf32, #tpu.memory_space<vmem>>, vector<96x8xf32>
    %cst_42 = arith.constant dense<0.000000e+00> : vector<96x128xf32>
    %126 = tpu.matmul %125, %64, %cst_42 {dimension_numbers = #tpu.dot_dimension_numbers<[1], [0], [0], [1], [0, 0, 1, 1], [], []>} : vector<96x8xf32>, vector<8x128xf32>, vector<96x128xf32> -> vector<96x128xf32>
    %127 = vector.extract_strided_slice %126 {offsets = [0, 0], sizes = [24, 128], strides = [1, 1]} : vector<96x128xf32> to vector<24x128xf32>
    %128 = vector.broadcast %115 : vector<1x128xf32> to vector<24x128xf32>
    %129 = arith.mulf %127, %128 : vector<24x128xf32>
    %130 = vector.extract_strided_slice %126 {offsets = [24, 0], sizes = [24, 128], strides = [1, 1]} : vector<96x128xf32> to vector<24x128xf32>
    %131 = vector.broadcast %118 : vector<1x128xf32> to vector<24x128xf32>
    %132 = arith.mulf %130, %131 : vector<24x128xf32>
    %133 = arith.addf %129, %132 : vector<24x128xf32>
    %134 = vector.extract_strided_slice %126 {offsets = [48, 0], sizes = [24, 128], strides = [1, 1]} : vector<96x128xf32> to vector<24x128xf32>
    %135 = vector.broadcast %121 : vector<1x128xf32> to vector<24x128xf32>
    %136 = arith.mulf %134, %135 : vector<24x128xf32>
    %137 = arith.addf %133, %136 : vector<24x128xf32>
    %138 = vector.extract_strided_slice %126 {offsets = [72, 0], sizes = [24, 128], strides = [1, 1]} : vector<96x128xf32> to vector<24x128xf32>
    %139 = vector.broadcast %124 : vector<1x128xf32> to vector<24x128xf32>
    %140 = arith.mulf %138, %139 : vector<24x128xf32>
    %141 = arith.addf %137, %140 : vector<24x128xf32>
    %142 = vector.extract_strided_slice %141 {offsets = [0, 0], sizes = [8, 128], strides = [1, 1]} : vector<24x128xf32> to vector<8x128xf32>
    %143 = arith.mulf %142, %102 : vector<8x128xf32>
    %cst_43 = arith.constant dense<0.000000e+00> : vector<128xf32>
    %144 = vector.multi_reduction <add>, %143, %cst_43 [0] : vector<8x128xf32> to vector<128xf32>
    %145 = vector.shape_cast %144 : vector<128xf32> to vector<1x128xf32>
    %146 = vector.extract_strided_slice %141 {offsets = [8, 0], sizes = [8, 128], strides = [1, 1]} : vector<24x128xf32> to vector<8x128xf32>
    %147 = arith.mulf %146, %102 : vector<8x128xf32>
    %cst_44 = arith.constant dense<0.000000e+00> : vector<128xf32>
    %148 = vector.multi_reduction <add>, %147, %cst_44 [0] : vector<8x128xf32> to vector<128xf32>
    %149 = vector.shape_cast %148 : vector<128xf32> to vector<1x128xf32>
    %150 = vector.extract_strided_slice %141 {offsets = [16, 0], sizes = [8, 128], strides = [1, 1]} : vector<24x128xf32> to vector<8x128xf32>
    %151 = arith.mulf %150, %102 : vector<8x128xf32>
    %cst_45 = arith.constant dense<0.000000e+00> : vector<128xf32>
    %152 = vector.multi_reduction <add>, %151, %cst_45 [0] : vector<8x128xf32> to vector<128xf32>
    %153 = vector.shape_cast %152 : vector<128xf32> to vector<1x128xf32>
    %154 = tpu.concatenate %145, %149, %153 in 0 : vector<1x128xf32>, vector<1x128xf32>, vector<1x128xf32> -> vector<3x128xf32>
    %c0_46 = arith.constant 0 : index
    %c0_47 = arith.constant 0 : index
    %155 = vector.load %arg3[%c0_46, %c0_47] : memref<3x128xf32, #tpu.memory_space<vmem>>, vector<3x128xf32>
    tpu.vector_store %arg3[%c0_46, %c0_47], %154 {strides = array<i32>} : memref<3x128xf32, #tpu.memory_space<vmem>>, vector<3x128xf32>,
    return
  }
  func.func @transform_0(%arg0: i32) -> (i32, i32) {
    %c0_i32 = arith.constant 0 : i32
    %c0_i32_0 = arith.constant 0 : i32
    return %c0_i32, %arg0 : i32, i32
  }
  func.func @transform_1(%arg0: i32) -> (i32, i32) {
    %c0_i32 = arith.constant 0 : i32
    %c0_i32_0 = arith.constant 0 : i32
    %c0_i32_1 = arith.constant 0 : i32
    return %c0_i32, %c0_i32_0 : i32, i32
  }
  func.func @transform_2(%arg0: i32) -> (i32, i32) {
    %c0_i32 = arith.constant 0 : i32
    %c0_i32_0 = arith.constant 0 : i32
    return %c0_i32, %arg0 : i32, i32
  }
}

</mosaic_0001>

<bundles_post_ra>
// kernel: ffd3d_forward.1
= control target key start
LH: loop header
LB: loop body
LE: loop exit
PB: predicated region body
PF: predicated region fallthrough
CT: control target
= control target key end

     0   :  { %v14_v0 = vlaneseq  ;;  %vm91_vm0 = vcmask 64512   ;;  %v370_v12 = vmov 0.0   ;;  %vm311_vm14 = vcmask 1040384   ;;  %s488_s0 = inlined_call_operand.vmem [shape: f32[3,128], index: 0, kind: input, shape index: {}]   ;;  %s489_s1 = inlined_call_operand.vmem [shape: f32[96,8], index: 1, kind: input, shape index: {}]   ;;  %s490_s2 = inlined_call_operand.vmem [shape: f32[3,128], index: 2, kind: output, shape index: {}]  }
   0x1   :  { %v320_v1 = vld [vmem:[%s488_s0 + $0x2] ss:$0 sm:$0xff]  ;;  %v85_v5 = vld [vmem:[%s489_s1 + $0x30] sm:$0xff]  ;;  %v80_v28 = vld [vmem:[%s489_s1 + $0x8] sm:$0xff]  ;;  %vm313_vm15 = vcmask 1041408  }
   0x2   :  { %v79_v2 = vld [vmem:[%s489_s1] sm:$0xff]  ;;  %v392_v3 = vshrl.u32 %v14_v0, 7  ;;  %v20_v4 = vsub.f32 1.0, %v320_v1  ;;  %358 = vmatprep.mubr.msk.f32.mxu1 %vm91_vm0, %v85_v5  ;;  %v86_v29 = vld [vmem:[%s489_s1 + $0x38] sm:$0xff]  ;;  %v81_v30 = vld [vmem:[%s489_s1 + $0x10] sm:$0xff] }
   0x3   :  { %349 = vmatprep.mubr.msk.f32.mxu0 %vm91_vm0, %v79_v2  ;;  %v87_v31 = vld [vmem:[%s489_s1 + $0x40] sm:$0xff]  ;;  %v82_v32 = vld [vmem:[%s489_s1 + $0x18] sm:$0xff]  ;;  %v88_v33 = vld [vmem:[%s489_s1 + $0x48] sm:$0xff] }
   0x4   :  { %vm21_vm1 = vcmp.ge.s32.totalorder %v392_v3, 1  ;;  %vm23_vm2 = vcmp.le.s32.totalorder %v392_v3, 3  ;;  %vm25_vm3 = vcmp.ge.s32.totalorder %v392_v3, 2  ;;  %vm28_vm4 = vcmp.le.s32.totalorder %v392_v3, 2  ;;  %v83_v34 = vld [vmem:[%s489_s1 + $0x20] sm:$0xff]  ;;  %v89_v35 = vld [vmem:[%s489_s1 + $0x50] sm:$0xff] }
   0x5   :  { %v22_v6 = vsel %vm21_vm1, %v320_v1, 1.0  ;;  %v24_v7 = vsel %vm23_vm2, %v20_v4, 1.0  ;;  %vm31_vm5 = vcmp.ge.s32.totalorder %v392_v3, 3  ;;  %vm34_vm6 = vcmp.le.s32.totalorder %v392_v3, 1  ;;  %v84_v36 = vld [vmem:[%s489_s1 + $0x28] sm:$0xff]  ;;  %v90_v37 = vld [vmem:[%s489_s1 + $0x58] sm:$0xff] }
   0x6   :  { %v26_v8 = vmul.f32 %v320_v1, %v22_v6  ;;  %v29_v9 = vmul.f32 %v24_v7, %v20_v4  ;;  %vm43_vm7 = vcmp.eq.s32.totalorder %v392_v3, 0  ;;  %vm45_vm8 = vcmp.eq.s32.totalorder %v392_v3, 1  ;;  %v12_v38 = vld [vmem:[%s488_s0 + $0x1] sm:$0x1]  ;;  %v321_v41 = vld [vmem:[%s488_s0] ss:$0 sm:$0xff] }
   0x7   :  { %vm47_vm9 = vcmp.eq.s32.totalorder %v392_v3, 2  ;;  %v44_v13 = vsel %vm43_vm7, 1.0, %v370_v12  ;;  %vm49_vm10 = vcmp.eq.s32.totalorder %v392_v3, 3  ;;  %vm51_vm11 = vcmp.eq.s32.totalorder %v392_v3, 4 }
   0x8   :  { %v27_v10 = vsel %vm25_vm3, %v26_v8, %v22_v6  ;;  %v30_v11 = vsel %vm28_vm4, %v29_v9, %v24_v7  ;;  %v46_v16 = vsel %vm45_vm8, 4.0, %v44_v13  ;;  %vm37_vm12 = vcmp.ge.s32.totalorder %v392_v3, 4 }
   0x9   :  { %v32_v14 = vmul.f32 %v320_v1, %v27_v10  ;;  %v35_v15 = vmul.f32 %v30_v11, %v20_v4  ;;  %v48_v17 = vsel %vm47_vm9, 6.0, %v46_v16  ;;  %vm40_vm13 = vcmp.le.s32.totalorder %v392_v3, 0 }
   0xa   :  { %v50_v20 = vsel %vm49_vm10, 4.0, %v48_v17  ;;  %v70_v39 = vsub.f32 1.0, %v12_v38  ;;  %v71_v40 = vmul.f32 %v12_v38, %v12_v38  ;;  %v75_v43 = vmul.f32 3.0, %v12_v38 }
   0xb   :  { %v33_v18 = vsel %vm31_vm5, %v32_v14, %v27_v10  ;;  %v36_v19 = vsel %vm34_vm6, %v35_v15, %v30_v11  ;;  %v52_v23 = vsel %vm51_vm11, 1.0, %v50_v20  ;;  %v59_v45 = vsub.f32 1.0, %v321_v41 }
   0xc   :  { %v38_v21 = vmul.f32 %v320_v1, %v33_v18  ;;  %v41_v22 = vmul.f32 %v36_v19, %v20_v4  ;;  %v72_v42 = vmul.f32 %v70_v39, %v70_v39  ;;  %v77_v44 = vmul.f32 3.0, %v71_v40 }
   0xd   :  { %v60_v46 = vsel %vm21_vm1, %v321_v41, 1.0  ;;  %v255_v48 = vsub.s32 0, %v392_v3  ;;  %v61_v52 = vsel %vm34_vm6, %v59_v45, 1.0  ;;  %v66_v53 = vsel %vm45_vm8, 2.0, %v44_v13 }
   0xe   :  { %v39_v24 = vsel %vm37_vm12, %v38_v21, %v33_v18  ;;  %v42_v25 = vsel %vm40_vm13, %v41_v22, %v36_v19  ;;  %v74_v47 = vmul.f32 %v72_v42, %v70_v39  ;;  %v76_v49 = vmul.f32 %v75_v43, %v72_v42 }
   0xf   :  { %v53_v26 = vmul.f32 %v52_v23, %v39_v24  ;;  %v62_v50 = vmul.f32 %v321_v41, %v60_v46  ;;  %v78_v51 = vmul.f32 %v77_v44, %v70_v39  ;;  %v73_v54 = vmul.f32 %v71_v40, %v12_v38 }
  0x10   :  { %v256_v57 = vrot.slane %v74_v47, %v255_v48  ;;  %v263_v59 = vrot.slane %v76_v49, %v255_v48  ;;  %v64_v62 = vmul.f32 %v61_v52, %v59_v45  ;;  %v67_v63 = vsel %vm47_vm9, 1.0, %v66_v53 }
  0x11   :  { %v54_v27 = vmul.f32 %v53_v26, %v42_v25  ;;  %v63_v61 = vsel %vm25_vm3, %v62_v50, %v60_v46  ;;  %v273_v0 = vrot.slane %v78_v51, %v255_v48  ;;  %v283_v1 = vrot.slane %v73_v54, %v255_v48 }
  0x12   :  { %v68_v8 = vmul.f32 %v67_v63, %v63_v61  ;;  %v65_v10 = vsel %vm40_vm13, %v64_v62, %v61_v52 }
  0x13   :  { %347 = vmatprep.subr.mxu0 %v54_v27  ;;  %367 = vmatprep.subr.mxu1 %v54_v27 }
  0x14   :  { %348 = vmatpush3.msra.mxu0 %v54_v27  ;;  %368 = vmatpush3.msra.mxu1 %v54_v27  ;;  %v69_v18 = vmul.f32 %v68_v8, %v65_v10 }
  0x15   :  { %350 = vmatmul.mubr.msk.f32.vlgmr.msra.gmra.mrb[0].mxu0 %vm91_vm0, %v80_v28  ;;  %359 = vmatmul.mubr.msk.f32.vlgmr.msra.gmra.mrb[0].mxu1 %vm91_vm0, %v86_v29 }
  0x16   :  { %352 = vmatprep.mubr.msk.f32.mxu0 %vm91_vm0, %v81_v30  ;;  %361 = vmatprep.mubr.msk.f32.mxu1 %vm91_vm0, %v87_v31 }
  0x19   :  { %353 = vmatmul.mubr.msk.f32.gmra.mrb[2].mxu0 %vm91_vm0, %v82_v32  ;;  %362 = vmatmul.mubr.msk.f32.gmra.mrb[2].mxu1 %vm91_vm0, %v88_v33 }
  0x1a   :  { %355 = vmatprep.mubr.msk.f32.mxu0 %vm91_vm0, %v83_v34  ;;  %364 = vmatprep.mubr.msk.f32.mxu1 %vm91_vm0, %v89_v35 }
  0x1d   :  { %356 = vmatmul.mubr.msk.f32.gmra.mrb[4].mxu0 %vm91_vm0, %v84_v36  ;;  %365 = vmatmul.mubr.msk.f32.gmra.mrb[4].mxu1 %vm91_vm0, %v90_v37 }
  0xe8   :  { %v351_v55 = vpop.f32.mrb[0].mxu0  ;;  %v360_v56 = vpop.f32.mrb[0].mxu1 }
  0xe9   :  { %v194_v58 = vpop.f32.mrb[1].mxu0  ;;  %v224_v60 = vpop.f32.mrb[1].mxu1  ;;  %v258_v22 = vmul.f32 %v351_v55, %v256_v57  ;;  %v275_v28 = vmul.f32 %v360_v56, %v273_v0 }
  0xea   :  { %v257_v5 = vmul.f32 %v256_v57, %v194_v58  ;;  %v274_v12 = vmul.f32 %v273_v0, %v224_v60 }
  0xec   :  { %v354_v2 = vpop.f32.mrb[2].mxu0  ;;  %v363_v4 = vpop.f32.mrb[2].mxu1 }
  0xed   :  { %v264_v6 = vmul.f32 %v354_v2, %v263_v59  ;;  %v204_v7 = vpop.f32.mrb[3].mxu0  ;;  %v234_v9 = vpop.f32.mrb[3].mxu1  ;;  %v284_v13 = vmul.f32 %v363_v4, %v283_v1 }
  0xee   :  { %v259_v17 = vmul.f32 %v256_v57, %v204_v7  ;;  %v276_v26 = vmul.f32 %v273_v0, %v234_v9 }
  0xef   :  { %v267_v11 = vadd.f32 %v264_v6, %v257_v5 }
  0xf0   :  { %v357_v14 = vpop.f32.mrb[4].mxu0  ;;  %v366_v15 = vpop.f32.mrb[4].mxu1 }
  0xf1   :  { %v277_v16 = vadd.f32 %v274_v12, %v267_v11  ;;  %v266_v19 = vmul.f32 %v357_v14, %v263_v59  ;;  %v214_v20 = vpop.f32.mrb[5].mxu0  ;;  %v244_v21 = vpop.f32.mrb[5].mxu1  ;;  %v286_v27 = vmul.f32 %v366_v15, %v283_v1 }
  0xf2   :  { %v265_v23 = vmul.f32 %v263_v59, %v214_v20  ;;  %v285_v29 = vmul.f32 %v283_v1, %v244_v21 }
  0xf3   :  { %v287_v24 = vadd.f32 %v284_v13, %v277_v16  ;;  %v269_v25 = vadd.f32 %v266_v19, %v259_v17 }
  0xf4   :  { %v268_v3 = vadd.f32 %v265_v23, %v258_v22 }
  0xf5   :  { %v290_v30 = vmul.f32 %v287_v24, %v69_v18  ;;  %v279_v31 = vadd.f32 %v276_v26, %v269_v25 }
  0xf6   :  { %v278_v32 = vadd.f32 %v275_v28, %v268_v3 }
  0xf7   :  { %v291_v33 = vrot.slane %v290_v30, 4  ;;  %v289_v34 = vadd.f32 %v286_v27, %v279_v31 }
  0xf8   :  { %v288_v35 = vadd.f32 %v285_v29, %v278_v32 }
  0xf9   :  { %v292_v36 = vadd.f32 %v291_v33, %v290_v30  ;;  %v304_v37 = vmul.f32 %v289_v34, %v69_v18 }
  0xfa   :  { %v297_v38 = vmul.f32 %v288_v35, %v69_v18 }
  0xfb   :  { %v293_v39 = vrot.slane %v292_v36, 2  ;;  %v305_v40 = vrot.slane %v304_v37, 4 }
  0xfc   :  { %v298_v41 = vrot.slane %v297_v38, 4 }
  0xfd   :  { %v306_v42 = vadd.f32 %v305_v40, %v304_v37  ;;  %v294_v43 = vadd.f32 %v293_v39, %v292_v36 }
  0xfe   :  { %v299_v44 = vadd.f32 %v298_v41, %v297_v38 }
  0xff   :  { %v307_v45 = vrot.slane %v306_v42, 2  ;;  %v295_v48 = vrot.slane %v294_v43, 1 }
 0x100   :  { %v300_v46 = vrot.slane %v299_v44, 2 }
 0x101   :  { %v308_v47 = vadd.f32 %v307_v45, %v306_v42  ;;  %v296_v52 = vadd.f32 %v295_v48, %v294_v43 }
 0x102   :  { %v301_v49 = vadd.f32 %v300_v46, %v299_v44 }
 0x103   :  { %v309_v50 = vrot.slane %v308_v47, 1 }
 0x104   :  { %v302_v51 = vrot.slane %v301_v49, 1 }
 0x105   :  { %v310_v54 = vadd.f32 %v309_v50, %v308_v47 }
 0x106   :  { %v303_v53 = vadd.f32 %v302_v51, %v301_v49 }
 0x108   :  { %v312_v55 = vsel %vm311_vm14, %v296_v52, %v303_v53 }
 0x109   :  { %v314_v56 = vsel %vm313_vm15, %v312_v55, %v310_v54 }
 0x10a   :  { %315 = vst [vmem:[%s490_s2] sm:$0x7] %v314_v56 }

</bundles_post_ra>
